<compile_context>
chip_gen: v5e
topology: v5e:2x2
jax: 0.10.0
libtpu: 0.0.40
codegen_flags: <defaults>
</compile_context>

<pallas_src>
import jax
import jax.numpy as jnp
from jax import lax
from jax.experimental import pallas as pl
from jax.experimental.pallas import tpu as pltpu


# ----------------------------------------------------------------------------
# Kernel
# ----------------------------------------------------------------------------
def _make_sdpa_kernel(has_mask, has_attn_out, inv_temperature):
    """SDPA kernel for one (nb, tq) block of queries.

    Ref order: q, k, v, [mask], out, [attn]
      q:    (nb, tq, Dk)       native dtype
      k:    (nb, Lk, Dk)       native dtype
      v:    (nb, Lk, Dv)       native dtype
      mask: (1|nb, tq, Lk)     int8
      out:  (nb, tq, Dv)
      attn: (nb, tq, Lk)
    """

    def kernel(*refs):
        q_ref, k_ref, v_ref = refs[0], refs[1], refs[2]
        pos = 3
        m_ref = None
        if has_mask:
            m_ref = refs[pos]
            pos += 1
        out_ref = refs[pos]
        pos += 1
        attn_ref = refs[pos] if has_attn_out else None

        # Operands stay in native dtype (bf16 x bf16 -> f32 fast MXU path).
        q = q_ref[...] * inv_temperature          # (nb, tq, Dk)
        k = k_ref[...]                            # (nb, Lk, Dk)
        v = v_ref[...]                            # (nb, Lk, Dv)

        # scores = (q / T) @ k^T without materializing a transpose of K.
        scores = lax.dot_general(
            q, k,
            dimension_numbers=(((2,), (2,)), ((0,), (0,))),
            preferred_element_type=jnp.float32)   # (nb, tq, Lk) f32

        if m_ref is not None:
            # compare the int8 mask directly -- no f32 cast pass.
            scores = jnp.where(m_ref[...] == 0,
                               jnp.float32(-1000000000.0), scores)

        # Numerically stable softmax in f32.
        row_max = jnp.max(scores, axis=-1, keepdims=True)
        e = jnp.exp(scores - row_max)
        denom = jnp.sum(e, axis=-1, keepdims=True)
        # approx reciprocal -> EUP slot, co-issues with VPU/MXU work.
        p = e * pl.reciprocal(denom, approx=True)

        # Cast the largest tensor once and reuse for attn store and P@V.
        p_lo = p.astype(v.dtype)
        if attn_ref is not None:
            if attn_ref.dtype == p_lo.dtype:
                attn_ref[...] = p_lo
            else:
                attn_ref[...] = p.astype(attn_ref.dtype)

        out_ref[...] = lax.dot_general(
            p_lo, v,
            dimension_numbers=(((2,), (1,)), ((0,), (0,))),
            preferred_element_type=jnp.float32).astype(out_ref.dtype)

    return kernel


# ----------------------------------------------------------------------------
# VMEM budget & tiling heuristics
# ----------------------------------------------------------------------------
def _physical_vmem_bytes():
    try:
        info = pltpu.get_tpu_info()
        for name in ("vmem_capacity_bytes", "vmem_bytes", "vmem_size_bytes"):
            val = getattr(info, name, None)
            if val:
                return int(val)
    except Exception:
        pass
    return 64 * 1024 * 1024  # conservative fallback (v7x per-TC size)


def _tq_candidates(Lq):
    """Candidate Lq tile sizes, largest first."""
    if Lq <= 512:
        return [Lq]
    cands = [t for t in (1024, 512, 256, 128) if Lq % t == 0]
    return cands if cands else [Lq]


def _step_vmem_bytes(nb, tq, Lk, Dk, Dv, isz, attn_isz, mask_rows,
                     return_attn, kv_buffers):
    """Per-grid-step VMEM estimate, incl. double-buffering + f32 temps."""
    b = 2 * nb * tq * Dk * isz               # q block (double-buffered)
    b += kv_buffers * nb * Lk * Dk * isz     # k block
    b += kv_buffers * nb * Lk * Dv * isz     # v block
    if mask_rows:
        b += 2 * mask_rows * tq * Lk         # int8 mask block
    b += 2 * nb * tq * Dv * isz              # out block
    if return_attn:
        b += 2 * nb * tq * Lk * attn_isz     # attn writeback block
    b += nb * tq * Lk * (4 + 4 + isz)        # f32 scores + exp + p_lo copy
    return b


def _choose_tiling(BH, Lq, Lk, Dk, Dv, isz, attn_isz, mask_mode,
                   return_attn, budget, nb_must_divide):
    """Pick (tq, nb, kv_buffers): biggest q tile first, then biggest nb
    that keeps n_bh >= 2 (so the megacore split lands on the BH axis)."""
    nb_cands = [n for n in range(min(BH, 32), 0, -1)
                if BH % n == 0 and
                (nb_must_divide is None or nb_must_divide % n == 0)]

    def mask_rows(nb):
        if mask_mode is None:
            return 0
        if mask_mode in ("shared_all", "shared_batch"):
            return 1
        return nb  # shared_heads / dense

    for tq in _tq_candidates(Lq):
        for prefer_split in (True, False):
            for kv_buffers in (2, 1):
                for nb in nb_cands:
                    if prefer_split and BH >= 2 and BH // nb < 2:
                        continue
                    if _step_vmem_bytes(nb, tq, Lk, Dk, Dv, isz, attn_isz,
                                        mask_rows(nb), return_attn,
                                        kv_buffers) <= budget:
                        return tq, nb, kv_buffers
    # Nothing fits comfortably: minimal config, single-buffered K/V.
    # TODO(synk): a flash-style Lk-tiled online softmax would bound VMEM for
    # very long Lk, but it cannot return the full attention matrix.
    return _tq_candidates(Lq)[-1], 1, 1


# ----------------------------------------------------------------------------
# Module wrapper
# ----------------------------------------------------------------------------
class ScaledDotProductAttention:
    """Scaled Dot-Product Attention (Pallas TPU)."""

    def __init__(self, temperature, attn_dropout=0.0):
        self.temperature = float(temperature)
        self.attn_dropout = float(attn_dropout)
        # TODO(synk): attn_dropout > 0 (training-mode dropout) not implemented;
        # with attn_dropout=0.0 / eval() the dropout is the identity.

    def __call__(self, q, k, v, mask=None, return_attn=True, attn_dtype=None):
        B, H, Lq, Dk = q.shape
        Lk = k.shape[2]
        Dv = v.shape[-1]
        BH = B * H

        qf = q.reshape(BH, Lq, Dk)
        kf = k.reshape(BH, Lk, Dk)
        vf = v.reshape(BH, Lk, Dv)

        # --- pad ragged long Lq to a multiple of 128 (pad rows are
        #     independent query rows; sliced off at the end).
        Lq_p = Lq
        if Lq > 512 and Lq % 128 != 0:
            Lq_p = ((Lq + 127) // 128) * 128
        pad_q = Lq_p - Lq
        if pad_q:
            qf = jnp.pad(qf, ((0, 0), (0, pad_q), (0, 0)))

        # --- mask normalization: keep the natural broadcast shape, int8.
        mask_arr = None
        mask_mode = None  # shared_all | shared_batch | shared_heads | dense
        nb_must_divide = None
        if mask is not None:
            m = jnp.asarray(mask)
            if m.ndim < 4:
                m = jnp.reshape(m, (1,) * (4 - m.ndim) + m.shape)
            Bm, Hm = m.shape[0], m.shape[1]
            if Bm not in (1, B) or Hm not in (1, H):
                raise ValueError(
                    f"mask leading dims {(Bm, Hm)} not broadcastable to "
                    f"{(B, H)}")
            m = jnp.broadcast_to(m, (Bm, Hm, Lq, Lk)).astype(jnp.int8)
            if Bm == 1 and Hm == 1:
                mask_mode, mask_arr = "shared_all", m.reshape(1, Lq, Lk)
            elif Hm == 1:                      # per-batch, shared over heads
                if H == 1:
                    mask_mode, mask_arr = "dense", m.reshape(BH, Lq, Lk)
                else:
                    mask_mode, mask_arr = "shared_batch", m.reshape(B, Lq, Lk)
                    nb_must_divide = H
            elif Bm == 1:                      # per-head, shared over batch
                if B == 1:
                    mask_mode, mask_arr = "dense", m.reshape(BH, Lq, Lk)
                else:
                    mask_mode, mask_arr = "shared_heads", m.reshape(H, Lq, Lk)
                    nb_must_divide = H
            else:                              # fully dense
                mask_mode, mask_arr = "dense", m.reshape(BH, Lq, Lk)
            if pad_q:
                mask_arr = jnp.pad(mask_arr, ((0, 0), (0, pad_q), (0, 0)),
                                   constant_values=1)

        # --- generation-aware scoped-VMEM budget and tiling.
        isz = jnp.dtype(q.dtype).itemsize
        attn_dt = jnp.dtype(attn_dtype) if attn_dtype is not None \
            else jnp.dtype(q.dtype)
        attn_isz = attn_dt.itemsize

        phys_vmem = _physical_vmem_bytes()
        # ~3/4 of physical, capped at 100 MiB: ~48 MiB on v7x, ~96 MiB on
        # 128 MiB parts (v5e/v6e); leaves compiler scratch headroom.
        vmem_limit = max(32 * 1024 * 1024,
                         min(int(phys_vmem * 3 // 4), 100 * 1024 * 1024))
        budget = int(vmem_limit * 0.85)

        tq, nb, kv_buffers = _choose_tiling(
            BH, Lq_p, Lk, Dk, Dv, isz, attn_isz, mask_mode, return_attn,
            budget, nb_must_divide)
        n_q = Lq_p // tq
        n_bh = BH // nb

        # --- BlockSpecs (grid = (bh_block, q_tile); K/V depend only on the
        #     bh axis so they stay resident across the inner Lq-tile loop).
        kv_kw = {} if kv_buffers == 2 else {"pipeline_mode": pl.Buffered(1)}
        q_spec = pl.BlockSpec((nb, tq, Dk), lambda i, j: (i, j, 0))
        k_spec = pl.BlockSpec((nb, Lk, Dk), lambda i, j: (i, 0, 0), **kv_kw)
        v_spec = pl.BlockSpec((nb, Lk, Dv), lambda i, j: (i, 0, 0), **kv_kw)
        out_spec = pl.BlockSpec((nb, tq, Dv), lambda i, j: (i, j, 0))
        # TODO(synk): for Dv < 128 a concat-heads [B, Lq, H*Dv] output layout
        # would make the store lane-dense, but it needs an extra transpose to
        # restore the module's [B, H, Lq, Dv] return layout.

        in_specs = [q_spec, k_spec, v_spec]
        inputs = [qf, kf, vf]
        if mask_arr is not None:
            nb_c, H_c = nb, H
            if mask_mode == "shared_all":
                mask_spec = pl.BlockSpec((1, tq, Lk), lambda i, j: (0, j, 0))
            elif mask_mode == "shared_batch":
                mask_spec = pl.BlockSpec(
                    (1, tq, Lk), lambda i, j: ((i * nb_c) // H_c, j, 0))
            elif mask_mode == "shared_heads":
                mask_spec = pl.BlockSpec(
                    (nb, tq, Lk),
                    lambda i, j: (((i * nb_c) % H_c) // nb_c, j, 0))
            else:  # dense
                mask_spec = pl.BlockSpec((nb, tq, Lk), lambda i, j: (i, j, 0))
            in_specs.append(mask_spec)
            inputs.append(mask_arr)

        if return_attn:
            out_shape = (
                jax.ShapeDtypeStruct((BH, Lq_p, Dv), q.dtype),
                jax.ShapeDtypeStruct((BH, Lq_p, Lk), attn_dt),
            )
            out_specs = (
                out_spec,
                pl.BlockSpec((nb, tq, Lk), lambda i, j: (i, j, 0)),
            )
        else:
            out_shape = jax.ShapeDtypeStruct((BH, Lq_p, Dv), q.dtype)
            out_specs = out_spec

        kernel = _make_sdpa_kernel(mask_arr is not None, return_attn,
                                   1.0 / self.temperature)

        # Steer the megacore split onto the BH axis when it has >= 2 blocks.
        dims = ("parallel", "arbitrary") if n_bh >= 2 \
            else ("parallel", "parallel")

        result = pl.pallas_call(
            kernel,
            out_shape=out_shape,
            grid_spec=pltpu.PrefetchScalarGridSpec(
                num_scalar_prefetch=0,
                grid=(n_bh, n_q),
                in_specs=in_specs,
                out_specs=out_specs,
            ),
            compiler_params=pltpu.CompilerParams(
                dimension_semantics=dims,
                vmem_limit_bytes=vmem_limit),
        )(*inputs)

        if return_attn:
            out, attn = result
        else:
            out, attn = result, None

        out = out[:, :Lq].reshape(B, H, Lq, Dv)
        if attn is not None:
            attn = attn[:, :Lq].reshape(B, H, Lq, Lk)
        return out, attn


# ----------------------------------------------------------------------------
# Pure-JAX reference + self-test
# ----------------------------------------------------------------------------
def _reference(q, k, v, temperature, mask=None):
    attn = jnp.einsum("bhqd,bhkd->bhqk",
                      q.astype(jnp.float32) / temperature,
                      k.astype(jnp.float32))
    if mask is not None:
        attn = jnp.where(mask == 0, -1000000000.0, attn)
    attn = jax.nn.softmax(attn, axis=-1)
    out = jnp.einsum("bhqk,bhkd->bhqd", attn, v.astype(jnp.float32))
    return out, attn


if __name__ == "__main__":
    B, H, Lq, Lk, Dk, Dv = 2, 2, 8, 8, 32, 32
    temperature = float(Dk) ** 0.5

    key = jax.random.PRNGKey(0)
    kq, kk, kv, km, km2 = jax.random.split(key, 5)
    q = jax.random.normal(kq, (B, H, Lq, Dk), dtype=jnp.float32)
    k = jax.random.normal(kk, (B, H, Lk, Dk), dtype=jnp.float32)
    v = jax.random.normal(kv, (B, H, Lk, Dv), dtype=jnp.float32)
    mask_b = (jax.random.uniform(km, (B, 1, Lq, Lk)) > 0.2).astype(jnp.int32)
    mask_h = (jax.random.uniform(km2, (1, H, Lq, Lk)) > 0.2).astype(jnp.int32)

    module = ScaledDotProductAttention(temperature=temperature,
                                       attn_dropout=0.0)

    # approx-reciprocal softmax (EUP) -> slightly looser f32 tolerances.
    TOL = dict(atol=2e-3, rtol=2e-3)

    # ---- unmasked path (f32) ----
    out, attn = module(q, k, v, mask=None)
    out = jax.block_until_ready(out)
    attn = jax.block_until_ready(attn)
    ref_out, ref_attn = _reference(q, k, v, temperature, mask=None)
    assert jnp.allclose(out, ref_out, **TOL)
    assert jnp.allclose(attn, ref_attn, **TOL)

    # ---- per-batch mask shared across heads ----
    out_m, attn_m = module(q, k, v, mask=mask_b)
    out_m = jax.block_until_ready(out_m)
    attn_m = jax.block_until_ready(attn_m)
    ref_out_m, ref_attn_m = _reference(q, k, v, temperature, mask=mask_b)
    assert jnp.allclose(out_m, ref_out_m, **TOL)
    assert jnp.allclose(attn_m, ref_attn_m, **TOL)

    # ---- per-head mask shared across batch ----
    out_h, attn_h = module(q, k, v, mask=mask_h)
    out_h = jax.block_until_ready(out_h)
    ref_out_h, ref_attn_h = _reference(q, k, v, temperature, mask=mask_h)
    assert jnp.allclose(out_h, ref_out_h, **TOL)
    assert jnp.allclose(attn_h, ref_attn_h, **TOL)

    # ---- output-only fast path (no O(Lq*Lk) attn writeback) ----
    out_only, attn_none = module(q, k, v, mask=mask_b, return_attn=False)
    out_only = jax.block_until_ready(out_only)
    assert attn_none is None
    assert jnp.allclose(out_only, ref_out_m, **TOL)

    # ---- bf16 fast MXU path ----
    qb = q.astype(jnp.bfloat16)
    kb = k.astype(jnp.bfloat16)
    vb = v.astype(jnp.bfloat16)
    out_b, attn_b = module(qb, kb, vb, mask=mask_b)
    out_b = jax.block_until_ready(out_b)
    assert jnp.allclose(out_b.astype(jnp.float32), ref_out_m,
                        atol=8e-2, rtol=5e-2)

    print("KERNEL_OK")
</pallas_src>

<mosaic_0001>
module attributes {stable_mosaic.version = 11 : i64} {
  func.func @kernel(%arg0: i32, %arg1: i32, %arg2: memref<2x8x32xf32, #tpu.memory_space<vmem>>, %arg3: memref<2x8x32xf32, #tpu.memory_space<vmem>>, %arg4: memref<2x8x32xf32, #tpu.memory_space<vmem>>, %arg5: memref<2x8x32xf32, #tpu.memory_space<vmem>>, %arg6: memref<2x8x8xf32, #tpu.memory_space<vmem>>) attributes {dimension_semantics = [#tpu.dimension_semantics<parallel>, #tpu.dimension_semantics<arbitrary>], iteration_bounds = array<i64: 2, 1>, scalar_prefetch = 0 : i64, scratch_operands = 0 : i64, tpu.core_type = #tpu.core_type<tc>, window_params = [{transform_indices = @transform_0, window_bounds = array<i64: 2, 8, 32>}, {transform_indices = @transform_1, window_bounds = array<i64: 2, 8, 32>}, {transform_indices = @transform_2, window_bounds = array<i64: 2, 8, 32>}, {transform_indices = @transform_3, window_bounds = array<i64: 2, 8, 32>}, {transform_indices = @transform_4, window_bounds = array<i64: 2, 8, 8>}]} {
    %c0 = arith.constant 0 : index
    %c0_0 = arith.constant 0 : index
    %c0_1 = arith.constant 0 : index
    %0 = vector.load %arg2[%c0, %c0_0, %c0_1] : memref<2x8x32xf32, #tpu.memory_space<vmem>>, vector<2x8x32xf32>
    %cst = arith.constant 0.176776692 : f32
    %1 = vector.broadcast %cst : f32 to vector<2x8x32xf32>
    %2 = arith.mulf %0, %1 : vector<2x8x32xf32>
    %c0_2 = arith.constant 0 : index
    %c0_3 = arith.constant 0 : index
    %c0_4 = arith.constant 0 : index
    %3 = vector.load %arg3[%c0_2, %c0_3, %c0_4] : memref<2x8x32xf32, #tpu.memory_space<vmem>>, vector<2x8x32xf32>
    %c0_5 = arith.constant 0 : index
    %c0_6 = arith.constant 0 : index
    %c0_7 = arith.constant 0 : index
    %4 = vector.load %arg4[%c0_5, %c0_6, %c0_7] : memref<2x8x32xf32, #tpu.memory_space<vmem>>, vector<2x8x32xf32>
    %cst_8 = arith.constant dense<0.000000e+00> : vector<2x8x8xf32>
    %5 = tpu.matmul %2, %3, %cst_8 {dimension_numbers = #tpu.dot_dimension_numbers<[2], [2], [1], [1], [0, 0, 0, 1, 1, 1], [0], [0]>} : vector<2x8x32xf32>, vector<2x8x32xf32>, vector<2x8x8xf32> -> vector<2x8x8xf32>
    %cst_9 = arith.constant dense<0xFF800000> : vector<2x8xf32>
    %6 = vector.multi_reduction <maximumf>, %5, %cst_9 [2] : vector<2x8x8xf32> to vector<2x8xf32>
    %7 = vector.shape_cast %6 : vector<2x8xf32> to vector<2x8x1xf32>
    %8 = vector.broadcast %7 : vector<2x8x1xf32> to vector<2x8x8xf32>
    %9 = arith.subf %5, %8 : vector<2x8x8xf32>
    %10 = math.exp %9 : vector<2x8x8xf32>
    %cst_10 = arith.constant dense<0.000000e+00> : vector<2x8xf32>
    %11 = vector.multi_reduction <add>, %10, %cst_10 [2] : vector<2x8x8xf32> to vector<2x8xf32>
    %12 = vector.shape_cast %11 : vector<2x8xf32> to vector<2x8x1xf32>
    %13 = tpu.reciprocal %12 {approx = true} : vector<2x8x1xf32> -> vector<2x8x1xf32>
    %14 = vector.broadcast %13 : vector<2x8x1xf32> to vector<2x8x8xf32>
    %15 = arith.mulf %10, %14 : vector<2x8x8xf32>
    %c0_11 = arith.constant 0 : index
    %c0_12 = arith.constant 0 : index
    %c0_13 = arith.constant 0 : index
    %16 = vector.load %arg6[%c0_11, %c0_12, %c0_13] : memref<2x8x8xf32, #tpu.memory_space<vmem>>, vector<2x8x8xf32>
    tpu.vector_store %arg6[%c0_11, %c0_12, %c0_13], %15 {strides = array<i32>} : memref<2x8x8xf32, #tpu.memory_space<vmem>>, vector<2x8x8xf32>,
    %cst_14 = arith.constant dense<0.000000e+00> : vector<2x8x32xf32>
    %17 = tpu.matmul %15, %4, %cst_14 {dimension_numbers = #tpu.dot_dimension_numbers<[2], [1], [1], [2], [0, 0, 0, 1, 1, 2], [0], [0]>} : vector<2x8x8xf32>, vector<2x8x32xf32>, vector<2x8x32xf32> -> vector<2x8x32xf32>
    %c0_15 = arith.constant 0 : index
    %c0_16 = arith.constant 0 : index
    %c0_17 = arith.constant 0 : index
    %18 = vector.load %arg5[%c0_15, %c0_16, %c0_17] : memref<2x8x32xf32, #tpu.memory_space<vmem>>, vector<2x8x32xf32>
    tpu.vector_store %arg5[%c0_15, %c0_16, %c0_17], %17 {strides = array<i32>} : memref<2x8x32xf32, #tpu.memory_space<vmem>>, vector<2x8x32xf32>,
    return
  }
  func.func @transform_0(%arg0: i32, %arg1: i32) -> (i32, i32, i32) {
    %c0_i32 = arith.constant 0 : i32
    %c0_i32_0 = arith.constant 0 : i32
    return %arg0, %arg1, %c0_i32 : i32, i32, i32
  }
  func.func @transform_1(%arg0: i32, %arg1: i32) -> (i32, i32, i32) {
    %c0_i32 = arith.constant 0 : i32
    %c0_i32_0 = arith.constant 0 : i32
    %c0_i32_1 = arith.constant 0 : i32
    return %arg0, %c0_i32, %c0_i32_0 : i32, i32, i32
  }
  func.func @transform_2(%arg0: i32, %arg1: i32) -> (i32, i32, i32) {
    %c0_i32 = arith.constant 0 : i32
    %c0_i32_0 = arith.constant 0 : i32
    %c0_i32_1 = arith.constant 0 : i32
    return %arg0, %c0_i32, %c0_i32_0 : i32, i32, i32
  }
  func.func @transform_3(%arg0: i32, %arg1: i32) -> (i32, i32, i32) {
    %c0_i32 = arith.constant 0 : i32
    %c0_i32_0 = arith.constant 0 : i32
    return %arg0, %arg1, %c0_i32 : i32, i32, i32
  }
  func.func @transform_4(%arg0: i32, %arg1: i32) -> (i32, i32, i32) {
    %c0_i32 = arith.constant 0 : i32
    %c0_i32_0 = arith.constant 0 : i32
    return %arg0, %arg1, %c0_i32 : i32, i32, i32
  }
}

</mosaic_0001>

<bundles_post_ra>
// kernel: tpu_custom_call.1
= control target key start
LH: loop header
LB: loop body
LE: loop exit
PB: predicated region body
PF: predicated region fallthrough
CT: control target
= control target key end

     0   :  { %s1235_s0 = inlined_call_operand.hbm [shape: f32[4,8,32], index: 0, kind: input, shape index: {}]   ;;  %s1236_s1 = inlined_call_operand.hbm [shape: f32[4,8,32], index: 1, kind: input, shape index: {}]   ;;  %s1237_s2 = inlined_call_operand.hbm [shape: f32[4,8,32], index: 2, kind: input, shape index: {}]   ;;  %s1238_s3 = inlined_call_operand.hbm [shape: f32[4,8,32], index: 3, kind: output, shape index: {0}]   ;;  %s1239_s4 = inlined_call_operand.hbm [shape: f32[4,8,8], index: 4, kind: output, shape index: {1}]  }
   0x1   :  { %1246 = sst [smem:[#allocation21_spill]] %s1236_s1 }
   0x2   :  { %10 = vsyncpa [#allocation3], 0 }
   0x3   :  { %12 = vsyncpa [#allocation3 + $0x1], 0 }
   0x4   :  { %13 = vsyncpa [#allocation6], 0 }
   0x5   :  { %15 = vsyncpa [#allocation6 + $0x1], 0 }
   0x6   :  { %16 = vsyncpa [#allocation4], 0 }
   0x7   :  { %18 = vsyncpa [#allocation4 + $0x1], 0 }
   0x8   :  { %19 = vsyncpa [#allocation10], 0 }
   0x9   :  { %21 = vsyncpa [#allocation10 + $0x1], 0  ;;  %s1037_s15 = smov 0   ;;  %s1039_s16 = smov 0  }
   0xa   :  { %s1041_s17 = smov 0   ;;  %s1043_s18 = smov 0  }
   0xb   :  { %s1045_s19 = smov 0   ;;  %s1047_s20 = smov 0  }
   0xc LB: > { %1247 = sst [smem:[#allocation15_spill]] %s994_s17  ;;  %s1068_s21 = sadd.s32 4294967295, %s1006_s20   ;;  %s1006_s20 = sphi %s1047_s20, %s27_s20   ;;  %s1002_s19 = sphi %s1045_s19, %s1265_s19   ;;  %s998_s18 = sphi %s1043_s18, %s1264_s18   ;;  %s994_s17 = sphi %s1041_s17, %s1263_s17   ;;  %s990_s16 = sphi %s1039_s16, %s1267_s16   ;;  %s986_s15 = sphi %s1037_s15, %s1266_s15  }
   0xd   : > { %1248 = sst [smem:[#allocation16_spill]] %s1002_s19  ;;  %s672_s22 = sadd.s32 4294967294, %s1006_s20  }
   0xe   : > { %1249 = sst [smem:[#allocation17_spill]] %s1006_s20  ;;  %s39_s23 = sadd.s32 1, %s1002_s19 }
   0xf   : > { %s48_s24 = sadd.s32 1, %s994_s17  ;;  %p41_p0 = scmp.ge.s32.totalorder %s39_s23, 2 }
  0x10   : > { %p55_p1 = scmp.ne.s32.totalorder %s994_s17, %s990_s16  ;;  %p56_p2 = scmp.eq.s32.totalorder %s1006_s20, 0 }
  0x11   : > { %p61_p3 = scmp.ne.s32.totalorder %s990_s16, %s986_s15  ;;  %s1269_s23 = smov (%p41_p0, %s39_s23), 0 }
  0x12   : > { %1250 = sst [smem:[#allocation18_spill]] %s1269_s23  ;;  %p1080_p4 = por %p56_p2, %p55_p1 }
  0x13   : > { %p62_p5 = scmp.eq.s32.totalorder %s1068_s21, 0  ;;  %s43_s26 = ssub.s32 %s1002_s19, %s1269_s23 }
  0x14   : > { %p139_p6 = scmp.eq.s32.totalorder %s1068_s21, 1  ;;  %p46_p7 = scmp.eq.s32.totalorder %s43_s26, 0 }
  0x15   : > { %p1088_p8 = por %p62_p5, %p61_p3  ;;  %p145_p10 = scmp.eq.s32.totalorder %s672_s22, 1 }
  0x16   : > { %p1092_p9 = por %p139_p6, %p55_p1  ;;  %p674_p12 = scmp.ge.s32.totalorder %s1006_s20, 2 }
  0x17   : > { %s1097_s29 = scalar_select %p46_p7, %s994_s17, %s48_s24  }
  0x18   : > { %p1099_p11 = por %p145_p10, %p61_p3  ;;  %p736_p13 = scmp.lt.s32.totalorder %s1006_s20, 2 }
  0x19   : > { %1254 = sst [smem:[#allocation19_spill]] %s1097_s29  ;;  %s193_s5 = sand.u32 1, %s994_s17  }
  0x1a   : > { %s1255_s30 = scalar_select %p1099_p11, 1, 0 }
  0x1b   : > { %s1106_s6 = sshll.u32 %s193_s5, 4  ;;  %s704_s7 = sshll.u32 %s1002_s19, 4 }
  0x1c   : > { %1256 = sst [smem:[#allocation20_spill]] %s1255_s30  ;;  %p1111_p0 = pnand %p736_p13, %p1080_p4 }
  0x1d   : > { %s216_s9 = sand.u32 1, %s1006_s20   ;;  %s1258_s1 = sld [smem:[#allocation21_spill]] }
  0x1e   : > { %s220_s14 = scalar_lea.vmem [#allocation5], %s1106_s6  ;;  %s217_s24 = scalar_lea.sflag [#allocation6], %s216_s9 }
  0x1f   : > { %s228_s22 = sshll.u32 %s220_s14, 4  ;;  %s1008_s26 = smov 128   ;;  %s229_s22 = int_to_ptr.vmem [resolvable:$true] %s228_s22 }
  0x20   : > { %s1009_s25 = smov 8   ;;  %p684_p1 = scmp.ge.s32.totalorder %s1006_s20, 1 }
  0x21   : > { %p258_p2 = scmp.lt.s32.totalorder %s1006_s20, 3  ;;  %s194_s9 = scalar_lea.sflag [#allocation3], %s193_s5 }
  0x22   : > { %s247_s29 = scalar_lea.hbm %s1237_s2, %s704_s7  ;;  %s242_s20 = scalar_lea.vmem [#allocation7], %s1106_s6 }
  0x23   : > { %s225_s12 = scalar_lea.hbm %s1258_s1, %s704_s7  ;;  %p1124_p3 = pnand %p684_p1, %p258_p2 }
  0x24   : > { %s226_s13 = sshll.u32 %s225_s12, 4  ;;  %s203_s12 = scalar_lea.hbm %s1235_s0, %s704_s7  ;;  %s227_s13 = int_to_ptr.hbm [resolvable:$true] %s226_s13 }
  0x25   : > { %725 = dma.hbm_to_vmem [thread:$0]  (!%p1111_p0), %s227_s13, 256, %s229_s22, %s217_s24, %s1008_s26, %s1008_s26, %s1009_s25  }
  0x26   : > { %s204_s14 = sshll.u32 %s203_s12, 4  ;;  %s197_s1 = scalar_lea.vmem [#allocation2], %s1106_s6  ;;  %s205_s14 = int_to_ptr.hbm [resolvable:$true] %s204_s14 }
  0x27   : > { %s206_s19 = sshll.u32 %s197_s1, 4  ;;  %s248_s17 = sshll.u32 %s247_s29, 4  ;;  %s207_s19 = int_to_ptr.vmem [resolvable:$true] %s206_s19  ;;  %s249_s17 = int_to_ptr.hbm [resolvable:$true] %s248_s17 }
  0x28   : > { %722 = dma.hbm_to_vmem [thread:$0]  (!%p1111_p0), %s205_s14, 256, %s207_s19, %s194_s9, %s1008_s26, %s1008_s26, %s1009_s25  }
  0x29   : > { %s250_s30 = sshll.u32 %s242_s20, 4  ;;  %262 = sbr.rel (%p1124_p3) target bundleno = 577 (0x241), region = 32  ;;  %s251_s30 = int_to_ptr.vmem [resolvable:$true] %s250_s30 }
  0x2a   : > { %728 = dma.hbm_to_vmem [thread:$0]  (!%p1111_p0), %s249_s17, 256, %s251_s30, %s217_s24, %s1008_s26, %s1008_s26, %s1009_s25  }
  0x2b   : > { %s1143_s1 = sand.u32 (!%p1124_p3), 1, %s990_s16  }
  0x2c   : > { %s1146_s19 = sshll.u32 (!%p1124_p3), %s1143_s1, 4  ;;  %s265_s5 = scalar_lea.sflag (!%p1124_p3), [#allocation3], %s1143_s1 }
  0x2d   : > { %s268_s29 = scalar_lea.vmem (!%p1124_p3), [#allocation2], %s1146_s19 }
  0x2e   : > { %969 = dma.done.wait (%p1088_p8), %s265_s5, 256  }
  0x2f   : > { %971 = vsyncadd (%p1088_p8), %s265_s5, 4294967040  ;;  %s274_s17 = sand.u32 1, %s1068_s21   ;;  %s278_s23 = scalar_lea.vmem [#allocation5], %s1146_s19 }
  0x30   : > { %s275_s20 = scalar_lea.sflag [#allocation6], %s274_s17 }
  0x31   : > { %973 = dma.done.wait (%p1088_p8), %s275_s20, 512  }
  0x32   : > { %975 = vsyncadd (%p1088_p8), %s275_s20, 4294966784  ;;  %vm342_vm0 = vcmask 261120   ;;  %v338_v0 = vld [vmem:[%s278_s23] sm:$0xff]  ;;  %v339_v2 = vld [vmem:[%s278_s23 + $0x8] sm:$0xff]  ;;  %vm395_vm1 = vcmask 64512   ;;  %s288_s21 = scalar_lea.vmem [#allocation7], %s1146_s19 }
  0x33   : > { %v334_v1 = vld [vmem:[%s268_s29] sm:$0xff]  ;;  %690 = vmatpush.xpose.msk.msra.mxu0 %vm342_vm0, %v338_v0  ;;  %692 = vmatpush.xpose.msk.msra.mxu1 %vm342_vm0, %v339_v2  ;;  %v335_v4 = vld [vmem:[%s268_s29 + $0x8] sm:$0xff]  ;;  %s328_s27 = scalar_lea.vmem [#allocation9], %s1146_s19  ;;  %s707_s30 = sshll.u32 %s998_s18, 4 }
  0x34   : > { %v336_v3 = vmul.f32 0.17677669, %v334_v1  ;;  %v337_v5 = vmul.f32 0.17677669, %v335_v4  ;;  %v340_v20 = vld [vmem:[%s288_s21] sm:$0xff]  ;;  %v341_v21 = vld [vmem:[%s288_s21 + $0x8] sm:$0xff]  ;;  %s504_s24 = scalar_lea.hbm %s1239_s4, %s707_s30 }
  0x35   : > { %438 = vmatpush.msra.mxu2 %v340_v20  ;;  %461 = vmatpush.msra.mxu3 %v341_v21  ;;  %s505_s6 = sshll.u32 %s328_s27, 4  ;;  %s507_s26 = sshll.u32 %s504_s24, 4  ;;  %s506_s6 = int_to_ptr.vmem [resolvable:$true] %s505_s6  ;;  %s508_s26 = int_to_ptr.hbm [resolvable:$true] %s507_s26 }
  0x36   : > { %691 = vmatmul.msk.f32.vlgmr.msra.gmra.mxu0 %vm342_vm0, %v336_v3  ;;  %693 = vmatmul.msk.f32.vlgmr.msra.gmra.mxu1 %vm342_vm0, %v337_v5  ;;  %s474_s25 = scalar_lea.sflag [#allocation10], %s1143_s1  ;;  %s902_s10 = sshra.s32 %s508_s26, 4  ;;  %s903_s10 = int_to_ptr.hbm [resolvable:$true] %s902_s10 }
  0x37   : > { %s904_s11 = scalar_lea.hbm %s903_s10, 16  ;;  %s908_s18 = scalar_lea.hbm %s1239_s4, 32 }
  0x38   : > { %p905_p4 = scmp.ne.s32.totalorder %s903_s10, %s904_s11  ;;  %p909_p7 = scmp.lt.s32.totalorder %s903_s10, %s1239_s4 }
  0x39   : > { %p910_p8 = scmp.lt.s32.totalorder %s908_s18, %s904_s11 }
  0x3a   : > { %p906_p5 = pnand %p905_p4, %p1092_p9 }
  0x3b   : > { %p911_p10 = por %p910_p8, %p909_p7 }
  0x3c   : > { %p907_p6 = pneg %p906_p5 }
  0x3e   : > { %p912_p13 = pnand %p911_p10, %p907_p6 }
  0xb3   : > { %v366_v6 = vpop.f32.mrf.mxu0  ;;  %v392_v8 = vpop.f32.mrf.mxu1 }
  0xb4   : > { %v396_v7 = vsel %vm395_vm1, %v366_v6, -inf  ;;  %v399_v9 = vsel %vm395_vm1, %v392_v8, -inf }
  0xb5   : > { %397 = vmax.xlane.f32.xlu0 %v396_v7 }
  0xbd   : > { %400 = vmax.xlane.f32.xlu0 %v399_v9 }
 0x128   : > { %v398_v10 = vpop.xlane.xlu0 %397 }
 0x129   : > { %v402_v11 = vsub.f32 %v366_v6, %v398_v10 }
 0x12b   : > { %v404_v12 = vmul.f32 1.442695, %v402_v11 }
 0x12d   : > { %790 = vpow2.f32 %v404_v12 }
 0x130   : > { %v401_v13 = vpop.xlane.xlu0 %400 }
 0x131   : > { %v403_v14 = vsub.f32 %v392_v8, %v401_v13 }
 0x133   : > { %v791_v15 = vpop.eup %790  ;;  %v406_v16 = vmul.f32 1.442695, %v403_v14 }
 0x134   : > { %v408_v17 = vsel %vm395_vm1, %v791_v15, 0.0 }
 0x135   : > { %792 = vpow2.f32 %v406_v16  ;;  %409 = vadd.xlane.f32.xlu1 %v408_v17 }
 0x13b   : > { %v793_v18 = vpop.eup %792 }
 0x13c   : > { %v411_v19 = vsel %vm395_vm1, %v793_v18, 0.0 }
 0x13d   : > { %412 = vadd.xlane.f32.xlu1 %v411_v19 }
 0x1a8   : > { %v410_v22 = vpop.xlane.xlu1 %409 }
 0x1a9   : > { %794 = vrcp.f32 %v410_v22 }
 0x1af   : > { %v795_v23 = vpop.eup %794 }
 0x1b0   : > { %v413_v24 = vpop.xlane.xlu1 %412  ;;  %v416_v25 = vmul.f32 %v795_v23, %v791_v15 }
 0x1b1   : > { %796 = vrcp.f32 %v413_v24 }
 0x1b2   : > { %418 = vst.msk [vmem:[%s328_s27] sm:$0xff] %vm395_vm1, %v416_v25  ;;  %694 = vmatmul.msk.f32.vlgmr.msra.gmra.mxu2 %vm395_vm1, %v416_v25 }
 0x1b7   : > { %v797_v26 = vpop.eup %796 }
 0x1b8   : > { %v417_v27 = vmul.f32 %v797_v26, %v793_v18 }
 0x1ba   : > { %419 = vst.msk [vmem:[%s328_s27 + $0x8] sm:$0xff] %vm395_vm1, %v417_v27  ;;  %695 = vmatmul.msk.f32.vlgmr.msra.gmra.mxu3 %vm395_vm1, %v417_v27 }
 0x1bb   : > { %915 = shalt.err (!%p912_p13)
}
 0x1bc   : > { %s1010_s22 = smov 128   ;;  %s1011_s5 = smov 8  }
 0x1bd   : > { %716 = dma.vmem_to_hbm [thread:$0]  (%p1092_p9), %s506_s6, 256, %s508_s26, %s474_s25, %s1010_s22, %s1010_s22, %s1011_s5  }
 0x1be   : > { %s321_s29 = scalar_lea.vmem [#allocation8], %s1146_s19  ;;  %s486_s23 = scalar_lea.hbm %s1238_s3, %s707_s30 }
 0x1bf   : > { %s487_s21 = sshll.u32 %s321_s29, 4  ;;  %s489_s27 = sshll.u32 %s486_s23, 4  ;;  %s488_s21 = int_to_ptr.vmem [resolvable:$true] %s487_s21  ;;  %s490_s27 = int_to_ptr.hbm [resolvable:$true] %s489_s27 }
 0x1c0   : > { %s469_s7 = scalar_lea.sflag [#allocation4], %s1143_s1  ;;  %s930_s8 = sshra.s32 %s490_s27, 4  ;;  %s931_s8 = int_to_ptr.hbm [resolvable:$true] %s930_s8 }
 0x1c1   : > { %s932_s6 = scalar_lea.hbm %s931_s8, 16  ;;  %s936_s26 = scalar_lea.hbm %s1238_s3, 32 }
 0x1c2   : > { %p933_p0 = scmp.ne.s32.totalorder %s931_s8, %s932_s6  ;;  %p937_p3 = scmp.lt.s32.totalorder %s931_s8, %s1238_s3 }
 0x1c3   : > { %p938_p4 = scmp.lt.s32.totalorder %s936_s26, %s932_s6 }
 0x1c4   : > { %p934_p1 = pnand %p933_p0, %p1092_p9 }
 0x1c5   : > { %p939_p5 = por %p938_p4, %p937_p3 }
 0x1c6   : > { %p935_p2 = pneg %p934_p1 }
 0x1c8   : > { %p940_p6 = pnand %p939_p5, %p935_p2 }
 0x235   : > { %v440_v28 = vpop.f32.mrf.mxu2 }
 0x236   : > { %466 = vst.msk [vmem:[%s321_s29] sm:$0xff] %vm342_vm0, %v440_v28 }
 0x23d   : > { %v463_v29 = vpop.f32.mrf.mxu3 }
 0x23e   : > { %467 = vst.msk [vmem:[%s321_s29 + $0x8] sm:$0xff] %vm342_vm0, %v463_v29 }
 0x23f   : > { %943 = shalt.err (!%p940_p6)
}
 0x240   : > { %715 = dma.vmem_to_hbm [thread:$0]  (%p1092_p9), %s488_s21, 256, %s490_s27, %s469_s7, %s1010_s22, %s1010_s22, %s1011_s5  }
 0x241 PF: > { %s1261_s10 = sld [smem:[#allocation17_spill]]  ;;  %s522_s11 = sand.u32 1, %s986_s15  }
 0x242   : > { %p730_p7 = pnand %p674_p12, %p1099_p11  ;;  %s523_s12 = scalar_lea.sflag [#allocation4], %s522_s11 }
 0x244   : > { %p731_p8 = pneg %p730_p7 }
 0x246   : > { %977 = dma.done.wait (%p731_p8), %s523_s12, 256  }
 0x247   : > { %979 = vsyncadd (%p731_p8), %s523_s12, 4294967040  ;;  %s533_s14 = scalar_lea.sflag [#allocation10], %s522_s11 }
 0x248   : > { %981 = dma.done.wait (%p731_p8), %s533_s14, 256  }
 0x249   : > { %983 = vsyncadd (%p731_p8), %s533_s14, 4294967040  ;;  %s27_s20 = sadd.s32 1, %s1261_s10   ;;  %s1262_s28 = sld [smem:[#allocation15_spill]] }
 0x24a   : > { %p24_p10 = scmp.ge.s32.totalorder %s27_s20, 4   ;;  %s1263_s17 = sld [smem:[#allocation19_spill]] }
 0x24b   : > { %s1264_s18 = sld [smem:[#allocation16_spill]]  ;;  %s1266_s15 = smov %s990_s16 }
 0x24c   : > { %s1265_s19 = sld [smem:[#allocation18_spill]]  ;;  %26 = sbr.rel (!%p24_p10) target bundleno = 12 (0xc), region = 118 }
 0x24f   : > { %s1267_s16 = smov %s1262_s28 }
 0x251   :  { %539 = vsyncpa [#allocation3], 1 }
 0x252   :  { %541 = vsyncpa [#allocation3 + $0x1], 1 }
 0x253   :  { %542 = vsyncpa [#allocation6], 1 }
 0x254   :  { %544 = vsyncpa [#allocation6 + $0x1], 1 }
 0x255   :  { %545 = vsyncpa [#allocation4], 1 }
 0x256   :  { %547 = vsyncpa [#allocation4 + $0x1], 1 }
 0x257   :  { %548 = vsyncpa [#allocation10], 1 }
 0x258   :  { %550 = vsyncpa [#allocation10 + $0x1], 1 }

</bundles_post_ra>
